<compile_context>
chip_gen: v7x
topology: tpu7x:2x2x1
jax: 0.10.0
libtpu: 0.0.40
codegen_flags: <defaults>
</compile_context>

<pallas_src>
import jax
import jax.numpy as jnp
import numpy as np
from jax import lax
from jax.experimental import pallas as pl
from jax.experimental.pallas import tpu as pltpu

C = 16            # channels after conv1 / conv2
GROUPS2 = 2       # groups for gn2
GPC = C // GROUPS2
EPS = 1e-5        # torch.nn.GroupNorm default eps

# rows of the packed (NROWS, C) parameter block (row-major, lane dim = C)
R_W1, R_G1, R_G2, R_BT2, R_D2G, R_TVAR = range(6)
NROWS = 8         # padded to a sublane multiple


def model_kernel(x_ref, w2_ref, p_ref, o_ref):
    # x_ref: (NB, HW)   w2_ref: (C, C)   p_ref: (NROWS, C)   o_ref: (NB, C, HW)
    x = x_ref[...].astype(jnp.float32)                       # (NB, HW)
    p = p_ref[...]                                            # (NROWS, C)
    w2 = w2_ref[...]                                          # (C, C), w2[o, c]

    row = lambda k: p[k:k + 1, :]                             # (1, C)
    w1, g1, g2, bt2 = row(R_W1), row(R_G1), row(R_G2), row(R_BT2)
    d2g, tvar = row(R_D2G), row(R_TVAR)                       # folded gn2 constants

    # ---- per-image spatial stats of the single input channel (two-pass) ----
    m_x = jnp.mean(x, axis=1, keepdims=True)                  # (NB, 1)
    xc = x - m_x                                              # (NB, HW)
    v_x = jnp.mean(xc * xc, axis=1, keepdims=True)            # (NB, 1)

    # ---- conv1 + gn1 folded:  h1n[:, c, :] = a[:, c] * xc + bt1_c ----
    a = (w1 * g1) * lax.rsqrt((w1 * w1) * v_x + EPS)          # (NB, C)

    # ---- conv2 folded:  h2[:, o, :] = s[:, o] * xc + t_o ----
    # s[n, o] = sum_c w2[o, c] * a[n, c]   (tiny (NB,16)x(16,16) contraction)
    s = lax.dot_general(a, w2,
                        dimension_numbers=(((1,), (1,)), ((), ())),
                        preferred_element_type=jnp.float32)   # (NB, C)

    # ---- gn2 folded group stats:  var_g = mean_{o in g}(s_o^2)*v_x + tvar_g ----
    ch = lax.broadcasted_iota(jnp.int32, (1, C), 1)
    in_g0 = ch < GPC                                          # (1, C)
    s2 = s * s
    sum0 = jnp.sum(jnp.where(in_g0, s2, 0.0), axis=1, keepdims=True)  # (NB, 1)
    sum1 = jnp.sum(jnp.where(in_g0, 0.0, s2), axis=1, keepdims=True)  # (NB, 1)
    msq = jnp.where(in_g0, sum0, sum1) * (1.0 / GPC)          # (NB, C)
    inv2 = lax.rsqrt(msq * v_x + tvar + EPS)                  # (NB, C)

    alpha = s * g2 * inv2                                     # (NB, C)
    beta = d2g * inv2 + bt2                                   # (NB, C)

    # ---- single output pass:  out[:, o, :] = alpha[:, o] * xc + beta[:, o] ----
    o_ref[...] = (alpha[:, :, None] * xc[:, None, :]
                  + beta[:, :, None]).astype(o_ref.dtype)


def _num_tensorcores():
    """Best-effort TensorCore-per-chip count (v7x has 2, v5e/v6e have 1)."""
    try:
        kind = jax.devices()[0].device_kind.lower()
        if "v7" in kind:
            return 2
    except Exception:
        pass
    return 1


def _pick_nb(n, hw, num_tc, budget_bytes=20 << 20):
    """Batch-block size: divisor of n that is either n itself or a multiple of 8
    (keeps the (NB, HW) input block tiling-legal), sized against a VMEM budget.
    On multi-TC chips prefer a step count that splits evenly across cores as
    long as the per-step output tile stays >= ~1 MiB."""
    out_b = C * hw * 4
    per_img = (4 + 4 * C) * hw * 4          # ~double-buffered io + live slabs
    cands = [d for d in range(1, n + 1) if n % d == 0 and (d == n or d % 8 == 0)]
    fitting = [d for d in cands if d * per_img <= budget_bytes] or [min(cands)]
    nb = max(fitting)
    if num_tc > 1 and n > 1:
        balanced = [d for d in fitting if (n // d) % num_tc == 0]
        if balanced and (max(balanced) * out_b >= (1 << 20) or nb * out_b < (1 << 20)):
            nb = max(balanced)
    return nb


def test_model_group_norm(x, w2, prows):
    # x: (N, 1, H, W) NCHW like PyTorch
    N, Cin, H, W = x.shape
    assert Cin == 1
    HW = H * W
    xf = x.reshape(N, HW)                     # squeeze the Cin=1 dim
    NB = _pick_nb(N, HW, _num_tensorcores())

    out = pl.pallas_call(
        model_kernel,
        out_shape=jax.ShapeDtypeStruct((N, C, HW), jnp.float32),
        grid_spec=pltpu.PrefetchScalarGridSpec(
            num_scalar_prefetch=0,
            grid=(N // NB,),
            in_specs=[
                pl.BlockSpec((NB, HW), lambda n: (n, 0)),
                pl.BlockSpec((C, C), lambda n: (0, 0)),
                pl.BlockSpec((NROWS, C), lambda n: (0, 0)),
            ],
            out_specs=pl.BlockSpec((NB, C, HW), lambda n: (n, 0, 0)),
        ),
        compiler_params=pltpu.CompilerParams(
            dimension_semantics=("parallel",),
            vmem_limit_bytes=32 << 20,        # safe on v5e/v6e/v7x
        ),
    )(xf, w2, prows)
    return out.reshape(N, C, H, W)


def make_params():
    """Raw module parameters exactly as the PyTorch spec initializes them."""
    ar = jnp.arange(C, dtype=jnp.float32)
    return dict(
        w1=1.0 + ar,                                    # conv1 weight (Cin=1, k=1)
        b1=jnp.full((C,), -2.0, jnp.float32),
        g1=jnp.ones((C,), jnp.float32),
        bt1=jnp.zeros((C,), jnp.float32),
        w2=jnp.ones((C, C), jnp.float32) + ar[:, None],  # conv2 weight (Cout, Cin)
        b2=jnp.full((C,), -2.0, jnp.float32),
        g2=jnp.ones((C,), jnp.float32),
        bt2=jnp.zeros((C,), jnp.float32),
    )


def fold_params(prm):
    """Fold model-constant algebra (exact) into a small (NROWS, C) row block.
    Note conv1's bias b1 drops out entirely (gn1 removes the per-channel mean)."""
    w2, bt1, b2, g2 = prm['w2'], prm['bt1'], prm['b2'], prm['g2']
    t = w2 @ bt1 + b2                                        # (C,) per-channel const
    tg = t.reshape(GROUPS2, GPC)
    mu = tg.mean(axis=1, keepdims=True)                      # gn2 group mean of t
    tvar = ((tg - mu) ** 2).mean(axis=1, keepdims=True)      # gn2 group var of t
    mu_c = jnp.broadcast_to(mu, (GROUPS2, GPC)).reshape(C)
    tvar_c = jnp.broadcast_to(tvar, (GROUPS2, GPC)).reshape(C)
    d2g = (t - mu_c) * g2

    rows = jnp.zeros((NROWS, C), jnp.float32)
    for idx, v in ((R_W1, prm['w1']), (R_G1, prm['g1']), (R_G2, g2),
                   (R_BT2, prm['bt2']), (R_D2G, d2g), (R_TVAR, tvar_c)):
        rows = rows.at[idx].set(v)
    return prm['w2'], rows


# ----- pure-JAX reference (unfolded) for correctness checking -----
def _group_norm_ref(x, groups, gamma, beta, eps=EPS):
    N, Cc, H, W = x.shape
    xg = x.reshape(N, groups, -1)
    m = xg.mean(-1, keepdims=True)
    v = ((xg - m) ** 2).mean(-1, keepdims=True)
    xn = ((xg - m) / jnp.sqrt(v + eps)).reshape(N, Cc, H, W)
    return xn * gamma.reshape(1, Cc, 1, 1) + beta.reshape(1, Cc, 1, 1)


def _reference(x, prm):
    h1 = x * prm['w1'].reshape(1, C, 1, 1) + prm['b1'].reshape(1, C, 1, 1)
    h1 = _group_norm_ref(h1, C, prm['g1'], prm['bt1'])
    h2 = jnp.einsum('oc,nchw->nohw', prm['w2'], h1) + prm['b2'].reshape(1, C, 1, 1)
    return _group_norm_ref(h2, GROUPS2, prm['g2'], prm['bt2'])


if __name__ == "__main__":
    key = jax.random.PRNGKey(0)
    x = jax.random.normal(key, (2, 1, 16, 16), dtype=jnp.float32)  # NCHW, Cin=1

    prm = make_params()
    w2, prows = fold_params(prm)
    out = test_model_group_norm(x, w2, prows)
    out = jax.block_until_ready(out)

    ref = _reference(x, prm)
    np.testing.assert_allclose(np.asarray(out), np.asarray(ref), rtol=1e-4, atol=1e-4)
    print("KERNEL_OK")
</pallas_src>

<mosaic_0001>
module attributes {stable_mosaic.version = 11 : i64} {
  func.func @model_kernel(%arg0: i32, %arg1: memref<2x256xf32, #tpu.memory_space<vmem>>, %arg2: memref<16x16xf32, #tpu.memory_space<vmem>>, %arg3: memref<8x16xf32, #tpu.memory_space<vmem>>, %arg4: memref<2x16x256xf32, #tpu.memory_space<vmem>>) attributes {dimension_semantics = [#tpu.dimension_semantics<parallel>], iteration_bounds = array<i64: 1>, scalar_prefetch = 0 : i64, scratch_operands = 0 : i64, tpu.core_type = #tpu.core_type<tc>, window_params = [{transform_indices = @transform_0, window_bounds = array<i64: 2, 256>}, {pipeline_mode = #tpu.pipeline_mode<synchronous>, transform_indices = @transform_1, window_bounds = array<i64: 16, 16>}, {pipeline_mode = #tpu.pipeline_mode<synchronous>, transform_indices = @transform_2, window_bounds = array<i64: 8, 16>}, {transform_indices = @transform_3, window_bounds = array<i64: 2, 16, 256>}]} {
    %c0 = arith.constant 0 : index
    %c0_0 = arith.constant 0 : index
    %0 = vector.load %arg1[%c0, %c0_0] : memref<2x256xf32, #tpu.memory_space<vmem>>, vector<2x256xf32>
    %c0_1 = arith.constant 0 : index
    %c0_2 = arith.constant 0 : index
    %1 = vector.load %arg3[%c0_1, %c0_2] : memref<8x16xf32, #tpu.memory_space<vmem>>, vector<8x16xf32>
    %c0_3 = arith.constant 0 : index
    %c0_4 = arith.constant 0 : index
    %2 = vector.load %arg2[%c0_3, %c0_4] : memref<16x16xf32, #tpu.memory_space<vmem>>, vector<16x16xf32>
    %3 = vector.extract_strided_slice %1 {offsets = [0, 0], sizes = [1, 16], strides = [1, 1]} : vector<8x16xf32> to vector<1x16xf32>
    %4 = vector.extract_strided_slice %1 {offsets = [1, 0], sizes = [1, 16], strides = [1, 1]} : vector<8x16xf32> to vector<1x16xf32>
    %5 = vector.extract_strided_slice %1 {offsets = [2, 0], sizes = [1, 16], strides = [1, 1]} : vector<8x16xf32> to vector<1x16xf32>
    %6 = vector.extract_strided_slice %1 {offsets = [3, 0], sizes = [1, 16], strides = [1, 1]} : vector<8x16xf32> to vector<1x16xf32>
    %7 = vector.extract_strided_slice %1 {offsets = [4, 0], sizes = [1, 16], strides = [1, 1]} : vector<8x16xf32> to vector<1x16xf32>
    %8 = vector.extract_strided_slice %1 {offsets = [5, 0], sizes = [1, 16], strides = [1, 1]} : vector<8x16xf32> to vector<1x16xf32>
    %cst = arith.constant dense<0.000000e+00> : vector<2xf32>
    %9 = vector.multi_reduction <add>, %0, %cst [1] : vector<2x256xf32> to vector<2xf32>
    %10 = vector.shape_cast %9 : vector<2xf32> to vector<2x1xf32>
    %cst_5 = arith.constant 2.560000e+02 : f32
    %11 = vector.broadcast %cst_5 : f32 to vector<2x1xf32>
    %12 = arith.divf %10, %11 : vector<2x1xf32>
    %13 = vector.broadcast %12 : vector<2x1xf32> to vector<2x256xf32>
    %14 = arith.subf %0, %13 : vector<2x256xf32>
    %15 = arith.mulf %14, %14 : vector<2x256xf32>
    %cst_6 = arith.constant dense<0.000000e+00> : vector<2xf32>
    %16 = vector.multi_reduction <add>, %15, %cst_6 [1] : vector<2x256xf32> to vector<2xf32>
    %17 = vector.shape_cast %16 : vector<2xf32> to vector<2x1xf32>
    %cst_7 = arith.constant 2.560000e+02 : f32
    %18 = vector.broadcast %cst_7 : f32 to vector<2x1xf32>
    %19 = arith.divf %17, %18 : vector<2x1xf32>
    %20 = arith.mulf %3, %4 : vector<1x16xf32>
    %21 = arith.mulf %3, %3 : vector<1x16xf32>
    %22 = vector.broadcast %21 : vector<1x16xf32> to vector<2x16xf32>
    %23 = vector.broadcast %19 : vector<2x1xf32> to vector<2x16xf32>
    %24 = arith.mulf %22, %23 : vector<2x16xf32>
    %cst_8 = arith.constant 9.99999974E-6 : f32
    %25 = vector.broadcast %cst_8 : f32 to vector<2x16xf32>
    %26 = arith.addf %24, %25 : vector<2x16xf32>
    %27 = math.rsqrt %26 : vector<2x16xf32>
    %28 = vector.broadcast %20 : vector<1x16xf32> to vector<2x16xf32>
    %29 = arith.mulf %28, %27 : vector<2x16xf32>
    %cst_9 = arith.constant dense<0.000000e+00> : vector<2x16xf32>
    %30 = tpu.matmul %29, %2, %cst_9 {dimension_numbers = #tpu.dot_dimension_numbers<[1], [1], [0], [0], [0, 0, 1, 0], [], []>} : vector<2x16xf32>, vector<16x16xf32>, vector<2x16xf32> -> vector<2x16xf32>
    %31 = tpu.iota {dimensions = array<i32: 1>} : vector<1x16xi32>
    %c8_i32 = arith.constant 8 : i32
    %32 = vector.broadcast %c8_i32 : i32 to vector<1x16xi32>
    %33 = arith.cmpi slt, %31, %32 : vector<1x16xi32>
    %34 = arith.mulf %30, %30 : vector<2x16xf32>
    %cst_10 = arith.constant 0.000000e+00 : f32
    %35 = vector.shape_cast %33 : vector<1x16xi1> to vector<1x16xi1>
    %36 = vector.broadcast %35 : vector<1x16xi1> to vector<2x16xi1>
    %37 = vector.broadcast %cst_10 : f32 to vector<2x16xf32>
    %38 = arith.select %36, %34, %37 : vector<2x16xi1>, vector<2x16xf32>
    %cst_11 = arith.constant dense<0.000000e+00> : vector<2xf32>
    %39 = vector.multi_reduction <add>, %38, %cst_11 [1] : vector<2x16xf32> to vector<2xf32>
    %40 = vector.shape_cast %39 : vector<2xf32> to vector<2x1xf32>
    %cst_12 = arith.constant 0.000000e+00 : f32
    %41 = vector.shape_cast %33 : vector<1x16xi1> to vector<1x16xi1>
    %42 = vector.broadcast %41 : vector<1x16xi1> to vector<2x16xi1>
    %43 = vector.broadcast %cst_12 : f32 to vector<2x16xf32>
    %44 = arith.select %42, %43, %34 : vector<2x16xi1>, vector<2x16xf32>
    %cst_13 = arith.constant dense<0.000000e+00> : vector<2xf32>
    %45 = vector.multi_reduction <add>, %44, %cst_13 [1] : vector<2x16xf32> to vector<2xf32>
    %46 = vector.shape_cast %45 : vector<2xf32> to vector<2x1xf32>
    %47 = vector.shape_cast %33 : vector<1x16xi1> to vector<1x16xi1>
    %48 = vector.broadcast %47 : vector<1x16xi1> to vector<2x16xi1>
    %49 = vector.shape_cast %40 : vector<2x1xf32> to vector<2x1xf32>
    %50 = vector.broadcast %49 : vector<2x1xf32> to vector<2x16xf32>
    %51 = vector.shape_cast %46 : vector<2x1xf32> to vector<2x1xf32>
    %52 = vector.broadcast %51 : vector<2x1xf32> to vector<2x16xf32>
    %53 = arith.select %48, %50, %52 : vector<2x16xi1>, vector<2x16xf32>
    %cst_14 = arith.constant 1.250000e-01 : f32
    %54 = vector.broadcast %cst_14 : f32 to vector<2x16xf32>
    %55 = arith.mulf %53, %54 : vector<2x16xf32>
    %56 = vector.broadcast %19 : vector<2x1xf32> to vector<2x16xf32>
    %57 = arith.mulf %55, %56 : vector<2x16xf32>
    %58 = vector.broadcast %8 : vector<1x16xf32> to vector<2x16xf32>
    %59 = arith.addf %57, %58 : vector<2x16xf32>
    %cst_15 = arith.constant 9.99999974E-6 : f32
    %60 = vector.broadcast %cst_15 : f32 to vector<2x16xf32>
    %61 = arith.addf %59, %60 : vector<2x16xf32>
    %62 = math.rsqrt %61 : vector<2x16xf32>
    %63 = vector.broadcast %5 : vector<1x16xf32> to vector<2x16xf32>
    %64 = arith.mulf %30, %63 : vector<2x16xf32>
    %65 = arith.mulf %64, %62 : vector<2x16xf32>
    %66 = vector.broadcast %7 : vector<1x16xf32> to vector<2x16xf32>
    %67 = arith.mulf %66, %62 : vector<2x16xf32>
    %68 = vector.broadcast %6 : vector<1x16xf32> to vector<2x16xf32>
    %69 = arith.addf %67, %68 : vector<2x16xf32>
    %70 = vector.shape_cast %65 : vector<2x16xf32> to vector<2x16x1xf32>
    %71 = vector.shape_cast %14 : vector<2x256xf32> to vector<2x1x256xf32>
    %72 = vector.broadcast %70 : vector<2x16x1xf32> to vector<2x16x256xf32>
    %73 = vector.broadcast %71 : vector<2x1x256xf32> to vector<2x16x256xf32>
    %74 = arith.mulf %72, %73 : vector<2x16x256xf32>
    %75 = vector.shape_cast %69 : vector<2x16xf32> to vector<2x16x1xf32>
    %76 = vector.broadcast %75 : vector<2x16x1xf32> to vector<2x16x256xf32>
    %77 = arith.addf %74, %76 : vector<2x16x256xf32>
    %c0_16 = arith.constant 0 : index
    %c0_17 = arith.constant 0 : index
    %c0_18 = arith.constant 0 : index
    %78 = vector.load %arg4[%c0_16, %c0_17, %c0_18] : memref<2x16x256xf32, #tpu.memory_space<vmem>>, vector<2x16x256xf32>
    tpu.vector_store %arg4[%c0_16, %c0_17, %c0_18], %77 {strides = array<i32>} : memref<2x16x256xf32, #tpu.memory_space<vmem>>, vector<2x16x256xf32>,
    return
  }
  func.func @transform_0(%arg0: i32) -> (i32, i32) {
    %c0_i32 = arith.constant 0 : i32
    %c0_i32_0 = arith.constant 0 : i32
    return %arg0, %c0_i32 : i32, i32
  }
  func.func @transform_1(%arg0: i32) -> (i32, i32) {
    %c0_i32 = arith.constant 0 : i32
    %c0_i32_0 = arith.constant 0 : i32
    %c0_i32_1 = arith.constant 0 : i32
    return %c0_i32, %c0_i32_0 : i32, i32
  }
  func.func @transform_2(%arg0: i32) -> (i32, i32) {
    %c0_i32 = arith.constant 0 : i32
    %c0_i32_0 = arith.constant 0 : i32
    %c0_i32_1 = arith.constant 0 : i32
    return %c0_i32, %c0_i32_0 : i32, i32
  }
  func.func @transform_3(%arg0: i32) -> (i32, i32, i32) {
    %c0_i32 = arith.constant 0 : i32
    %c0_i32_0 = arith.constant 0 : i32
    %c0_i32_1 = arith.constant 0 : i32
    return %arg0, %c0_i32, %c0_i32_0 : i32, i32, i32
  }
}

</mosaic_0001>

<bundles_post_ra>
// kernel: tpu_custom_call.1
= control target key start
LH: loop header
LB: loop body
LE: loop exit
PB: predicated region body
PF: predicated region fallthrough
CT: control target
= control target key end

     0   :  { %8 = vsyncpa [#allocation3], 0  ;;  %s598_s0 = inlined_call_operand.hbm [shape: f32[2,256], index: 0, kind: input, shape index: {}]   ;;  %s599_s1 = inlined_call_operand.hbm [shape: f32[16,16], index: 1, kind: input, shape index: {}]   ;;  %s600_s2 = inlined_call_operand.hbm [shape: f32[8,16], index: 2, kind: input, shape index: {}]   ;;  %s601_s3 = inlined_call_operand.hbm [shape: f32[2,16,256], index: 3, kind: output, shape index: {}]  }
   0x1   :  { %9 = vsyncpa [#allocation6], 0 }
   0x2   :  { %10 = vsyncpa [#allocation4], 0  ;;  %s485_s12 = smov [#allocation5]   ;;  %s391_s16 = scalar_lea.hbm %s599_s1, 256 }
   0x3   :  { %s26_s13 = sshll.u32 %s485_s12, 4  ;;  %p392_p0 = scmp.ne.s32.totalorder %s599_s1, %s391_s16  ;;  %s27_s13 = int_to_ptr.vmem [resolvable:$true] %s26_s13 }
   0x4   :  { %p395_p1 = scmp.lt.u32.totalorder %s391_s16, %s599_s1 }
   0x6   :  { %p397_p2 = pnand %p395_p1, %p392_p0 }
   0x8   :  { %400 = shalt.err (!%p397_p2)
}
   0x9   :  { %s401_s21 = scalar_lea.vmem %s27_s13, 256  ;;  %p406_p4 = scmp.lt.s32.totalorder %s27_s13, %s27_s13 }
   0xa   :  { %p402_p3 = scmp.ne.s32.totalorder %s27_s13, %s401_s21  ;;  %p407_p5 = scmp.lt.s32.totalorder %s401_s21, %s401_s21 }
   0xc   :  { %p408_p6 = por %p407_p5, %p406_p4 }
   0xe   :  { %p409_p7 = pnand %p408_p6, %p402_p3 }
  0x10   :  { %412 = shalt.err (!%p409_p7)
}
  0x11   :  { %s486_s22 = smov 128   ;;  %s487_s23 = smov 8  }
  0x12   :  { %32 = dma.hbm_to_vmem [thread:$0]  %s599_s1, 256, %s27_s13, [#allocation6], %s486_s22, %s486_s22, %s487_s23  }
  0x13   :  { %s488_s26 = smov [#allocation2]   ;;  %s489_s28 = smov [#allocation7]  }
  0x14   :  { %s17_s27 = sshll.u32 %s488_s26, 4  ;;  %s39_s29 = sshll.u32 %s489_s28, 4  ;;  %s18_s27 = int_to_ptr.vmem [resolvable:$true] %s17_s27  ;;  %s40_s29 = int_to_ptr.vmem [resolvable:$true] %s39_s29 }
  0x15   :  { %s413_s5 = scalar_lea.hbm %s598_s0, 64 }
  0x16   :  { %p414_p8 = scmp.ne.s32.totalorder %s598_s0, %s413_s5  ;;  %p417_p9 = scmp.lt.u32.totalorder %s413_s5, %s598_s0 }
  0x18   :  { %p419_p10 = pnand %p417_p9, %p414_p8 }
  0x1a   :  { %422 = shalt.err (!%p419_p10)
}
  0x1b   :  { %s423_s1 = scalar_lea.vmem %s18_s27, 64  ;;  %p428_p12 = scmp.lt.s32.totalorder %s18_s27, %s18_s27 }
  0x1c   :  { %p424_p11 = scmp.ne.s32.totalorder %s18_s27, %s423_s1  ;;  %p429_p13 = scmp.lt.s32.totalorder %s423_s1, %s423_s1 }
  0x1e   :  { %p430_p0 = por %p429_p13, %p428_p12 }
  0x20   :  { %p431_p1 = pnand %p430_p0, %p424_p11 }
  0x22   :  { %434 = shalt.err (!%p431_p1)
}
  0x23   :  { %20 = dma.hbm_to_vmem [thread:$0]  %s598_s0, 64, %s18_s27, [#allocation3]  }
  0x24   :  { %s435_s14 = scalar_lea.hbm %s600_s2, 128 }
  0x25   :  { %p436_p2 = scmp.ne.s32.totalorder %s600_s2, %s435_s14  ;;  %p439_p3 = scmp.lt.u32.totalorder %s435_s14, %s600_s2 }
  0x27   :  { %p441_p4 = pnand %p439_p3, %p436_p2 }
  0x29   :  { %444 = shalt.err (!%p441_p4)
}
  0x2a   :  { %s445_s19 = scalar_lea.vmem %s40_s29, 128  ;;  %p450_p6 = scmp.lt.s32.totalorder %s40_s29, %s40_s29 }
  0x2b   :  { %p446_p5 = scmp.ne.s32.totalorder %s40_s29, %s445_s19  ;;  %p451_p7 = scmp.lt.s32.totalorder %s445_s19, %s445_s19 }
  0x2d   :  { %p452_p8 = por %p451_p7, %p450_p6 }
  0x2f   :  { %p453_p9 = pnand %p452_p8, %p446_p5 }
  0x31   :  { %456 = shalt.err (!%p453_p9)
}
  0x32   :  { %42 = dma.hbm_to_vmem [thread:$0]  %s600_s2, 128, %s40_s29, [#allocation6]  }
  0x33   :  { %479 = dma.done.wait [#allocation3], 64  }
  0x34   :  { %480 = vsyncadd [#allocation3], 4294967232 }
  0x35   :  { %481 = dma.done.wait [#allocation6], 384  }
  0x36   :  { %482 = vsyncadd [#allocation6], 4294966912  ;;  %v60_v0 = vlaneseq  ;;  %v490_v1 = vmov 1983009808   ;;  %v52_v6 = vld [vmem:[#allocation2] sm:$0xf] }
  0x37   :  { %v58_v2 = vunpack.c.l.s4 %v490_v1  ;;  %vm67_vm0 = vcmask 1041408   ;;  %v491_v12 = vmov 269488144   ;;  %v54_v26 = vld [vmem:[#allocation5] sm:$0xff]  ;;  %v55_v27 = vld [vmem:[#allocation5 + $0x8] sm:$0xff]  ;;  %vm120_vm1 = vcmask 130048  }
  0x38   :  { %v555_v3 = vshrl.u32 %v60_v0, 7  ;;  %v77_v13 = vunpack.c.l.s4 %v491_v12  ;;  %v492_v28 = vmov 0.0|0.0   ;;  %v370_v29 = vpack.c.bf16 %v55_v27, %v54_v26  ;;  %vm371_vm2 = vmpackc.low %vm120_vm1, %vm120_vm1  ;;  %v53_v31 = vld [vmem:[#allocation7] sm:$0xff]  ;;  %s496_s2 = smov [#allocation8]  }
  0x39   :  { %v59_v4 = vunpack.c.0.s8 %v58_v2  ;;  %369 = vmatprep.subr.bf16.mxu0 %v492_v28  ;;  %vm493_vm3 = vmmov 0   ;;  %v494_v30 = vmov 0.0   ;;  %v107_v32 = vmul.f32 %v53_v31, %v53_v31  ;;  %s343_s21 = sshll.u32 %s496_s2, 4  ;;  %s344_s21 = int_to_ptr.vmem [resolvable:$true] %s343_s21 }
  0x3a   :  { %v78_v14 = vunpack.c.0.s8 %v77_v13  ;;  %366 = vmatprep.mubr.msk.f32.mxu0 %vm493_vm3, %v494_v30  ;;  %372 = vmatpush3.bf16.xpose.msk.msra.mxu0 %vm371_vm2, %v370_v29  ;;  %v570_v33 = vsub.s32 0, %v555_v3  ;;  %v104_v39 = vrot.slane %v53_v31, 1  ;;  %v201_v44 = vand.u32 127, %v60_v0  ;;  %s457_s22 = scalar_lea.vmem %s344_s21, 1024  ;;  %p462_p11 = scmp.lt.s32.totalorder %s344_s21, %s344_s21 }
  0x3b   :  { %v62_v5 = vsub.s32 %v59_v4, %v555_v3  ;;  %vm207_vm5 = vcmask 123904   ;;  %v220_v53 = vsub.s32 5, %v555_v3  ;;  %v227_v61 = vsub.s32 2, %v555_v3  ;;  %p458_p10 = scmp.ne.s32.totalorder %s344_s21, %s457_s22  ;;  %p463_p12 = scmp.lt.s32.totalorder %s457_s22, %s457_s22 }
  0x3c   :  { %v81_v15 = vsub.s32 %v78_v14, %v555_v3  ;;  %v111_v34 = vrot.slane %v107_v32, %v570_v33  ;;  %v106_v40 = vmul.f32 %v104_v39, %v53_v31  ;;  %vm202_vm4 = vcmp.lt.s32.totalorder %v201_v44, 8 }
  0x3d   :  { %v63_v7 = vrot.slane %v52_v6, %v62_v5  ;;  %v221_v56 = vrot.slane %v53_v31, %v220_v53  ;;  %v233_v62 = vsub.s32 4, %v555_v3  ;;  %v228_v63 = vrot.slane %v53_v31, %v227_v61  ;;  %p464_p13 = por %p463_p12, %p462_p11 }
  0x3e   :  { %v118_v41 = vrot.slane %v106_v40, %v570_v33  ;;  %v238_v0 = vsub.s32 3, %v555_v3  ;;  %v495_v14 = vmov 1966171168  }
  0x3f   :  { %v64_v8 = vcombine.high %v63_v7, %v63_v7  ;;  %v68_v9 = vsel %vm67_vm0, %v63_v7, 0.0  ;;  %v234_v1 = vrot.slane %v53_v31, %v233_v62  ;;  %p465_p0 = pnand %p464_p13, %p458_p10 }
  0x40   :  { %v239_v4 = vrot.slane %v53_v31, %v238_v0 }
  0x41   :  { %v69_v10 = vsel %vm67_vm0, %v64_v8, 0.0 }
  0x42   :  { %v70_v11 = vadd.f32 %v69_v10, %v68_v9  ;;  %v254_v10 = vsub.s32 1, %v555_v3 }
  0x44   :  { %71 = vadd.xlane.f32.xlu0 %v70_v11 }
  0xd1   :  { %v72_v16 = vpop.xlane.xlu0 %71 }
  0xd2   :  { %v74_v17 = vmul.f32 0.00390625, %v72_v16 }
  0xd4   :  { %v82_v18 = vrot.slane %v74_v17, %v81_v15  ;;  %v265_v15 = vunpack.c.l.s4 %v495_v14 }
  0xd6   :  { %v561_v19 = vsub.f32 %v52_v6, %v82_v18  ;;  %v266_v16 = vunpack.c.0.s8 %v265_v15 }
  0xd8   :  { %v85_v20 = vmul.f32 %v561_v19, %v561_v19  ;;  %v269_v17 = vsub.s32 %v266_v16, %v555_v3 }
  0xda   :  { %v93_v21 = vrot.slane %v85_v20, %v62_v5  ;;  %v270_v18 = vrot.slane %v561_v19, %v269_v17 }
  0xdc   :  { %v94_v22 = vcombine.high %v93_v21, %v93_v21  ;;  %v97_v23 = vsel %vm67_vm0, %v93_v21, 0.0 }
  0xde   :  { %v98_v24 = vsel %vm67_vm0, %v94_v22, 0.0  ;;  %v275_v22 = vrot.slane %v270_v18, %v570_v33 }
  0xdf   :  { %v99_v25 = vadd.f32 %v98_v24, %v97_v23  ;;  %v279_v23 = vrot.slane %v270_v18, %v254_v10  ;;  %v271_v24 = vcombine.high %v270_v18, %v270_v18 }
  0xe1   :  { %100 = vadd.xlane.f32.xlu0 %v99_v25  ;;  %v283_v29 = vrot.slane %v271_v24, %v570_v33  ;;  %v287_v30 = vrot.slane %v271_v24, %v254_v10 }
 0x16e   :  { %v101_v35 = vpop.xlane.xlu0 %100 }
 0x16f   :  { %v102_v36 = vmul.f32 0.00390625, %v101_v35 }
 0x171   :  { %v112_v37 = vmul.f32 %v111_v34, %v102_v36 }
 0x173   :  { %v113_v38 = vadd.f32 1e-05, %v112_v37 }
 0x175   :  { %387 = vrsqrt.f32 %v113_v38 }
 0x17f   :  { %v388_v42 = vpop.eup %387 }
 0x180   :  { %v119_v43 = vmul.f32 %v388_v42, %v118_v41 }
 0x182   :  { %367 = vmatmul.mubr.msk.f32.vlgmr.msra.gmra.mrb[0].mxu0 %vm120_vm1, %v119_v43 }
 0x255   :  { %v196_v45 = vpop.f32.mrb[0].mxu0 }
 0x256   :  { %v203_v46 = vmul.f32 %v196_v45, %v196_v45  ;;  %v368_v47 = vpop.f32.mrb[1].mxu0  ;;  %v229_v2 = vmul.f32 %v228_v63, %v196_v45 }
 0x258   :  { %v206_v48 = vsel %vm202_vm4, %v203_v46, 0.0  ;;  %v211_v50 = vsel %vm202_vm4, 0.0, %v203_v46 }
 0x259   :  { %v208_v49 = vsel %vm207_vm5, %v206_v48, 0.0  ;;  %v212_v51 = vsel %vm207_vm5, %v211_v50, 0.0 }
 0x25a   :  { %209 = vadd.xlane.f32.xlu1 %v208_v49 }
 0x25e   :  { %213 = vadd.xlane.f32.xlu1 %v212_v51 }
 0x2e7   :  { %v210_v52 = vpop.xlane.xlu1 %209 }
 0x2eb   :  { %v214_v54 = vpop.xlane.xlu1 %213 }
 0x2ec   :  { %v215_v55 = vsel %vm202_vm4, %v210_v52, %v214_v54 }
 0x2ed   :  { %v216_v57 = vmul.f32 0.125, %v215_v55 }
 0x2ef   :  { %v217_v58 = vmul.f32 %v216_v57, %v102_v36 }
 0x2f1   :  { %v222_v59 = vadd.f32 %v221_v56, %v217_v58 }
 0x2f3   :  { %v223_v60 = vadd.f32 1e-05, %v222_v59 }
 0x2f5   :  { %389 = vrsqrt.f32 %v223_v60 }
 0x2ff   :  { %v390_v5 = vpop.eup %389 }
 0x300   :  { %v230_v6 = vmul.f32 %v390_v5, %v229_v2  ;;  %v235_v7 = vmul.f32 %v390_v5, %v234_v1 }
 0x302   :  { %v244_v8 = vrot.slane %v230_v6, %v570_v33  ;;  %v240_v9 = vadd.f32 %v239_v4, %v235_v7  ;;  %v255_v11 = vrot.slane %v230_v6, %v254_v10 }
 0x304   :  { %250 = vbcast.lane.b32.xlu1 %v244_v8, 264  ;;  %246 = vbcast.lane.b32.xlu0 %v244_v8, 256  ;;  %v303_v12 = vrot.slane %v240_v9, %v570_v33  ;;  %v314_v13 = vrot.slane %v240_v9, %v254_v10 }
 0x308   :  { %257 = vbcast.lane.b32.xlu1 %v255_v11, 256  ;;  %305 = vbcast.lane.b32.xlu0 %v303_v12, 256 }
 0x30c   :  { %261 = vbcast.lane.b32.xlu1 %v255_v11, 264  ;;  %316 = vbcast.lane.b32.xlu0 %v314_v13, 256 }
 0x310   :  { %309 = vbcast.lane.b32.xlu1 %v303_v12, 264 }
 0x314   :  { %320 = vbcast.lane.b32.xlu1 %v314_v13, 264 }
 0x376   :  { %v251_v20 = vpop.permute.xlu1 %250  ;;  %v247_v21 = vpop.permute.xlu0 %246 }
 0x377   :  { %v292_v25 = vmul.f32 %v275_v22, %v247_v21  ;;  %v293_v26 = vmul.f32 %v279_v23, %v247_v21  ;;  %v294_v38 = vmul.f32 %v275_v22, %v251_v20  ;;  %v295_v39 = vmul.f32 %v279_v23, %v251_v20 }
 0x37a   :  { %v258_v27 = vpop.permute.xlu1 %257  ;;  %v306_v28 = vpop.permute.xlu0 %305 }
 0x37b   :  { %v322_v31 = vadd.f32 %v306_v28, %v292_v25  ;;  %v323_v32 = vadd.f32 %v306_v28, %v293_v26  ;;  %v296_v34 = vmul.f32 %v283_v29, %v258_v27  ;;  %v297_v35 = vmul.f32 %v287_v30, %v258_v27 }
 0x37d   :  { %330 = vst [vmem:[#allocation8] sm:$0xff] %v322_v31  ;;  %331 = vst [vmem:[#allocation8 + $0x8] sm:$0xff] %v323_v32 }
 0x37e   :  { %v262_v3 = vpop.permute.xlu1 %261  ;;  %v317_v19 = vpop.permute.xlu0 %316 }
 0x37f   :  { %v326_v36 = vadd.f32 %v317_v19, %v296_v34  ;;  %v327_v37 = vadd.f32 %v317_v19, %v297_v35  ;;  %v298_v33 = vmul.f32 %v283_v29, %v262_v3  ;;  %v299_v43 = vmul.f32 %v287_v30, %v262_v3 }
 0x381   :  { %334 = vst [vmem:[#allocation8 + $0x20] sm:$0xff] %v326_v36  ;;  %335 = vst [vmem:[#allocation8 + $0x28] sm:$0xff] %v327_v37 }
 0x382   :  { %v310_v40 = vpop.permute.xlu1 %309 }
 0x383   :  { %v324_v41 = vadd.f32 %v310_v40, %v294_v38  ;;  %v325_v42 = vadd.f32 %v310_v40, %v295_v39 }
 0x385   :  { %332 = vst [vmem:[#allocation8 + $0x10] sm:$0xff] %v324_v41  ;;  %333 = vst [vmem:[#allocation8 + $0x18] sm:$0xff] %v325_v42 }
 0x386   :  { %v321_v44 = vpop.permute.xlu1 %320 }
 0x387   :  { %v328_v45 = vadd.f32 %v321_v44, %v298_v33  ;;  %v329_v46 = vadd.f32 %v321_v44, %v299_v43 }
 0x389   :  { %336 = vst [vmem:[#allocation8 + $0x30] sm:$0xff] %v328_v45  ;;  %337 = vst [vmem:[#allocation8 + $0x38] sm:$0xff] %v329_v46 }
 0x38a   :  { %468 = shalt.err (!%p465_p0)
}
 0x38b   :  { %s469_s25 = scalar_lea.hbm %s601_s3, 1024 }
 0x38c   :  { %p470_p1 = scmp.ne.s32.totalorder %s601_s3, %s469_s25  ;;  %p473_p2 = scmp.lt.u32.totalorder %s469_s25, %s601_s3 }
 0x38e   :  { %p475_p3 = pnand %p473_p2, %p470_p1 }
 0x390   :  { %478 = shalt.err (!%p475_p3)
}
 0x391   :  { %s497_s30 = smov 256   ;;  %s498_s4 = smov 16  }
 0x392   :  { %349 = dma.vmem_to_hbm [thread:$0]  %s344_s21, 1024, %s601_s3, [#allocation4], %s497_s30, %s497_s30, %s498_s4  }
 0x393   :  { %483 = dma.done.wait [#allocation4], 1024  }
 0x394   :  { %484 = vsyncadd [#allocation4], 4294966272 }
 0x395   :  { %353 = vsyncpa [#allocation3], 1 }
 0x396   :  { %354 = vsyncpa [#allocation6], 1 }
 0x397   :  { %355 = vsyncpa [#allocation4], 1 }

</bundles_post_ra>
